<compile_context>
chip_gen: v7x
topology: tpu7x:2x2x1
jax: 0.10.0
libtpu: 0.0.40
codegen_flags: <defaults>
</compile_context>

<pallas_src>
import functools

import jax
import jax.numpy as jnp
from jax.experimental import pallas as pl
from jax.experimental.pallas import tpu as pltpu


def _tanh_kernel(x_ref, o_ref, *, compute_dtype):
    x = x_ref[...]
    o_ref[...] = jnp.tanh(x.astype(compute_dtype)).astype(o_ref.dtype)


def _device_kind() -> str:
    try:
        return jax.devices()[0].device_kind.lower()
    except Exception:
        return ""


def _block_budget(kind: str):
    """Return (max_block_bytes, vmem_limit_bytes_or_None) per TPU generation."""
    if "v7" in kind:
        # 4 x 8 MiB (in + out, double-buffered) = 32 MiB; raise the scoped
        # VMEM limit (default 32 MiB, physical 64 MiB) for scratch headroom.
        return 8 * 1024 * 1024, 48 * 1024 * 1024
    if "v6" in kind:
        # 4 x 6 MiB = 24 MiB fits the 32 MiB v6e scoped default with headroom.
        return 6 * 1024 * 1024, None
    # v5e (16 MiB scoped default), older, or unknown chips: stay conservative.
    return 2 * 1024 * 1024, None


def pallas_tanh(x: jax.Array) -> jax.Array:
    """Elementwise Tanh via Pallas; forward-equivalent to the reference module."""
    orig_shape = x.shape
    orig_dtype = x.dtype
    n = x.size
    if n == 0:
        return x  # empty input: nothing to do
    itemsize = jnp.dtype(orig_dtype).itemsize

    kind = _device_kind()
    max_block_bytes, vmem_limit = _block_budget(kind)

    # Dtype-aware sublane multiple: 8 (f32), 16 (bf16/f16), 32 (int8/fp8).
    sublane = max(8, 32 // itemsize)

    # bf16 EUP/VPU exist on v6e/v7x -> compute tanh directly in bf16 there;
    # everywhere else (and for any other dtype) compute in f32.
    if orig_dtype == jnp.bfloat16 and ("v6" in kind or "v7" in kind):
        compute_dtype = jnp.bfloat16
    else:
        compute_dtype = jnp.float32

    kernel = functools.partial(_tanh_kernel, compute_dtype=compute_dtype)

    def _compiler_params():
        kwargs = dict(dimension_semantics=("parallel",))
        if vmem_limit is not None:
            kwargs["vmem_limit_bytes"] = vmem_limit
        return pltpu.CompilerParams(**kwargs)

    flat = x.reshape(-1)  # free bitcast for contiguous row-major input

    # --- Small ragged fast path: one full-extent (1, n) block, no pad/slice.
    if n % 128 != 0 and n * itemsize <= 128 * 1024:
        x2d = flat.reshape(1, n)
        out2d = pl.pallas_call(
            kernel,
            out_shape=jax.ShapeDtypeStruct((1, n), orig_dtype),
            grid=(1,),
            in_specs=[pl.BlockSpec((1, n), lambda i: (0, 0))],
            out_specs=pl.BlockSpec((1, n), lambda i: (0, 0)),
            compiler_params=_compiler_params(),
            cost_estimate=pl.CostEstimate(
                flops=0, transcendentals=n, bytes_accessed=2 * n * itemsize),
        )(x2d)
        return out2d.reshape(orig_shape)

    # --- Choose lane width: widest multiple of 128 dividing n exactly,
    # preferring one that leaves >= 2*sublane rows so the grid can split.
    lanes = None
    for w in (2048, 1024, 512, 256, 128):
        if n % w == 0 and (n // w) >= 2 * sublane:
            lanes = w
            break
    if lanes is None:
        for w in (2048, 1024, 512, 256, 128):
            if n % w == 0:
                lanes = w
                break
    if lanes is None:
        lanes = 128

    if n % lanes == 0:
        padded_n = n
    else:
        # TODO(synk): large ragged inputs still pay a full-array pad + final
        # slice (two extra HBM passes); a masked-tail store would avoid them.
        padded_n = pl.cdiv(n, lanes) * lanes
        flat = jnp.pad(flat, (0, padded_n - n))

    rows = padded_n // lanes
    x2d = flat.reshape(rows, lanes)

    # Largest tile (in rows) that keeps block_bytes <= the per-gen budget,
    # rounded to the dtype sublane multiple.
    max_tile_rows = max(
        sublane,
        ((max_block_bytes // (lanes * itemsize)) // sublane) * sublane,
    )

    if rows <= max_tile_rows:
        if rows >= 2 * sublane:
            # Split into >= 2 grid steps so the "parallel" axis can be
            # sharded across both v7x TensorCores (single block = one core).
            tile_rows = pl.cdiv(pl.cdiv(rows, 2), sublane) * sublane
        else:
            tile_rows = rows  # equals the full dim -> always a legal block
    else:
        tile_rows = max_tile_rows

    grid = (pl.cdiv(rows, tile_rows),)

    cost = pl.CostEstimate(
        flops=0,
        transcendentals=padded_n,
        bytes_accessed=2 * padded_n * itemsize,
    )

    out2d = pl.pallas_call(
        kernel,
        out_shape=jax.ShapeDtypeStruct((rows, lanes), orig_dtype),
        grid=grid,
        in_specs=[pl.BlockSpec((tile_rows, lanes), lambda i: (i, 0))],
        out_specs=pl.BlockSpec((tile_rows, lanes), lambda i: (i, 0)),
        compiler_params=_compiler_params(),
        cost_estimate=cost,
    )(x2d)

    out_flat = out2d.reshape(-1)
    if padded_n != n:
        out_flat = out_flat[:n]
    return out_flat.reshape(orig_shape)


if __name__ == "__main__":
    key = jax.random.PRNGKey(0)

    # Small NCHW-like input consistent with how such activations are used.
    x = jax.random.normal(key, (2, 4, 16, 16), dtype=jnp.float32)
    # Large-magnitude values exercise saturation (the naive two-exp formula
    # would NaN here; tanh must return +/-1).
    x = x.at[0, 0, 0, 0].set(120.0).at[0, 0, 0, 1].set(-120.0)

    y = jax.block_until_ready(pallas_tanh(x))
    ref = jnp.tanh(x)
    assert y.shape == x.shape and y.dtype == x.dtype
    assert jnp.max(jnp.abs(y - ref)) < 1e-5

    # Ragged (non-128-aligned) size exercises the pad-free (1, n) path.
    x2 = jax.random.normal(jax.random.PRNGKey(1), (3, 5, 7), dtype=jnp.float32)
    y2 = jax.block_until_ready(pallas_tanh(x2))
    assert jnp.max(jnp.abs(y2 - jnp.tanh(x2))) < 1e-5

    # bf16 path (computed natively in bf16 on v6e/v7x, upcast elsewhere).
    x3 = jax.random.normal(jax.random.PRNGKey(2), (2, 4, 16, 16)).astype(jnp.bfloat16)
    y3 = jax.block_until_ready(pallas_tanh(x3))
    assert y3.dtype == jnp.bfloat16 and y3.shape == x3.shape
    err = jnp.max(jnp.abs(y3.astype(jnp.float32) - jnp.tanh(x3.astype(jnp.float32))))
    assert err < 2e-2

    # Empty input early-return path.
    x4 = jnp.zeros((0, 4), dtype=jnp.float32)
    y4 = pallas_tanh(x4)
    assert y4.shape == (0, 4)

    print("KERNEL_OK")
</pallas_src>

<mosaic_0001>
module attributes {stable_mosaic.version = 11 : i64} {
  func.func @_tanh_kernel(%arg0: i32, %arg1: memref<8x128xf32, #tpu.memory_space<vmem>>, %arg2: memref<8x128xf32, #tpu.memory_space<vmem>>) attributes {dimension_semantics = [#tpu.dimension_semantics<parallel>], iteration_bounds = array<i64: 2>, scalar_prefetch = 0 : i64, scratch_operands = 0 : i64, tpu.core_type = #tpu.core_type<tc>, window_params = [{transform_indices = @transform_0, window_bounds = array<i64: 8, 128>}, {transform_indices = @transform_1, window_bounds = array<i64: 8, 128>}]} {
    %c0 = arith.constant 0 : index
    %c0_0 = arith.constant 0 : index
    %0 = vector.load %arg1[%c0, %c0_0] : memref<8x128xf32, #tpu.memory_space<vmem>>, vector<8x128xf32>
    %1 = math.tanh %0 : vector<8x128xf32>
    %c0_1 = arith.constant 0 : index
    %c0_2 = arith.constant 0 : index
    %2 = vector.load %arg2[%c0_1, %c0_2] : memref<8x128xf32, #tpu.memory_space<vmem>>, vector<8x128xf32>
    tpu.vector_store %arg2[%c0_1, %c0_2], %1 {strides = array<i32>} : memref<8x128xf32, #tpu.memory_space<vmem>>, vector<8x128xf32>,
    return
  }
  func.func @transform_0(%arg0: i32) -> (i32, i32) {
    %c0_i32 = arith.constant 0 : i32
    %c0_i32_0 = arith.constant 0 : i32
    return %arg0, %c0_i32 : i32, i32
  }
  func.func @transform_1(%arg0: i32) -> (i32, i32) {
    %c0_i32 = arith.constant 0 : i32
    %c0_i32_0 = arith.constant 0 : i32
    return %arg0, %c0_i32 : i32, i32
  }
}

</mosaic_0001>

<bundles_post_ra>
// kernel: tpu_custom_call.1
= control target key start
LH: loop header
LB: loop body
LE: loop exit
PB: predicated region body
PF: predicated region fallthrough
CT: control target
= control target key end

     0   :  { %6 = vsyncpa [#allocation3], 0  ;;  %s550_s0 = inlined_call_operand.hbm [shape: f32[16,128], index: 0, kind: input, shape index: {}]   ;;  %s551_s1 = inlined_call_operand.hbm [shape: f32[16,128], index: 1, kind: output, shape index: {}]  }
   0x1   :  { %8 = vsyncpa [#allocation3 + $0x1], 0 }
   0x2   :  { %9 = vsyncpa [#allocation4], 0 }
   0x3   :  { %11 = vsyncpa [#allocation4 + $0x1], 0  ;;  %s389_s6 = smov 0   ;;  %s391_s7 = smov 0  }
   0x4   :  { %s393_s8 = smov 0   ;;  %s395_s9 = smov 0  }
   0x5 LB: > { %s410_s10 = sadd.s32 4294967295, %s375_s9   ;;  %s219_s11 = sadd.s32 4294967294, %s375_s9   ;;  %s375_s9 = sphi %s395_s9, %s566_s9   ;;  %s371_s8 = sphi %s393_s8, %s565_s8   ;;  %s367_s7 = sphi %s391_s7, %s564_s7   ;;  %s363_s6 = sphi %s389_s6, %s563_s6  }
   0x6   : > { %s414_s12 = sadd.s32 1, %s375_s9   ;;  %s24_s13 = sadd.s32 1, %s371_s8 }
   0x7   : > { %s21_s14 = ssub.s32 %s375_s9, %s414_s12  ;;  %p31_p0 = scmp.ne.s32.totalorder %s371_s8, %s367_s7 }
   0x8   : > { %p22_p1 = scmp.eq.s32.totalorder %s21_s14, 0  ;;  %p32_p2 = scmp.eq.s32.totalorder %s375_s9, 0 }
   0x9   : > { %p37_p3 = scmp.ne.s32.totalorder %s367_s7, %s363_s6  ;;  %p38_p4 = scmp.eq.s32.totalorder %s410_s10, 0 }
   0xa   : > { %s426_s15 = scalar_select %p22_p1, %s371_s8, %s24_s13  }
   0xb   : > { %p428_p5 = por %p32_p2, %p31_p0  ;;  %p432_p6 = por %p38_p4, %p37_p3 }
   0xc   : > { %p61_p7 = scmp.eq.s32.totalorder %s410_s10, 1  ;;  %p67_p8 = scmp.eq.s32.totalorder %s219_s11, 1 }
   0xd   : > { %p243_p10 = scmp.lt.s32.totalorder %s375_s9, 2  ;;  %s87_s20 = sand.u32 1, %s371_s8  }
   0xe   : > { %p439_p11 = por %p61_p7, %p31_p0  ;;  %p443_p12 = por %p67_p8, %p37_p3 }
   0xf   : > { %s223_s21 = sshll.u32 %s375_s9, 7  ;;  %s222_s22 = sshll.u32 %s87_s20, 3 }
  0x10   : > { %s555_s18 = scalar_select %p439_p11, 1, 0 }
  0x11   : > { %s556_s19 = scalar_select %p443_p12, 1, 0 }
  0x12   : > { %s452_s25 = scalar_lea.hbm %s550_s0, %s223_s21  ;;  %s91_s26 = scalar_lea.vmem [#allocation2], %s222_s22 }
  0x13   : > { %s98_s27 = sshll.u32 %s91_s26, 4  ;;  %p456_p13 = pnand %p243_p10, %p428_p5  ;;  %s460_s27 = int_to_ptr.vmem [resolvable:$true] %s98_s27 }
  0x14   : > { %s88_s29 = scalar_lea.sflag [#allocation3], %s87_s20  ;;  %s279_s30 = scalar_lea.hbm %s452_s25, 128 }
  0x15   : > { %p280_p2 = scmp.ne.s32.totalorder %s452_s25, %s279_s30  ;;  %p281_p3 = pneg %p456_p13 }
  0x16   : > { %s284_s4 = scalar_lea.hbm %s550_s0, 256  ;;  %p285_p5 = scmp.lt.u32.totalorder %s452_s25, %s550_s0 }
  0x17   : > { %p282_p4 = pnand %p281_p3, %p280_p2  ;;  %p286_p8 = scmp.lt.u32.totalorder %s284_s4, %s279_s30 }
  0x18   : > { %p288_p9 = scmp.lt.u32.totalorder %s279_s30, %s452_s25 }
  0x19   : > { %p283_p7 = pneg %p282_p4  ;;  %p287_p10 = por %p286_p8, %p285_p5 }
  0x1b   : > { %p289_p0 = por %p288_p9, %p287_p10 }
  0x1d   : > { %p290_p1 = pnand %p289_p0, %p283_p7 }
  0x1f   : > { %293 = shalt.err (!%p290_p1)
}
  0x20   : > { %s294_s13 = scalar_lea.vmem %s460_s27, 128  ;;  %s377_s14 = smov [#allocation2]  }
  0x21   : > { %p295_p2 = scmp.ne.s32.totalorder %s460_s27, %s294_s13  ;;  %s299_s16 = sshll.u32 %s377_s14, 4  ;;  %s300_s16 = int_to_ptr.vmem [resolvable:$false] %s299_s16 }
  0x22   : > { %s301_s20 = scalar_lea.vmem %s300_s16, 256  ;;  %p302_p11 = scmp.lt.s32.totalorder %s460_s27, %s300_s16 }
  0x23   : > { %p297_p4 = pnand %p295_p2, %p281_p3  ;;  %p303_p5 = scmp.lt.s32.totalorder %s301_s20, %s294_s13 }
  0x25   : > { %p298_p12 = pneg %p297_p4  ;;  %p304_p8 = por %p303_p5, %p302_p11 }
  0x27   : > { %p305_p9 = pnand %p304_p8, %p298_p12 }
  0x29   : > { %308 = shalt.err (!%p305_p9)
}
  0x2a   : > { %238 = dma.hbm_to_vmem [thread:$0]  (!%p456_p13), %s452_s25, 128, %s460_s27, %s88_s29  }
  0x2b   : > { %p558_p0 = scmp.lt.s32.totalorder %s375_s9, 3  ;;  %p559_p1 = scmp.ge.s32.totalorder %s375_s9, 1 }
  0x2d   : > { %p104_p3 = pnand %p559_p1, %p558_p0 }
  0x2e   : > { %s494_s21 = sand.u32 (!%p104_p3), 1, %s367_s7  }
  0x2f   : > { %107 = sbr.rel (%p104_p3) target bundleno = 81 (0x51), region = 24  ;;  %s225_s22 = sshll.u32 (!%p104_p3), %s494_s21, 3 }
  0x30   : > { %s110_s23 = scalar_lea.sflag (!%p104_p3), [#allocation3], %s494_s21  ;;  %s113_s24 = scalar_lea.vmem (!%p104_p3), [#allocation2], %s225_s22 }
  0x36   : > { %354 = dma.done.wait (%p432_p6), %s110_s23, 128  }
  0x37   : > { %356 = vsyncadd (%p432_p6), %s110_s23, 4294967168  ;;  %v132_v0 = vld [vmem:[%s113_s24] sm:$0xff]  ;;  %s131_s25 = scalar_lea.vmem [#allocation5], %s225_s22  ;;  %s228_s27 = sshll.u32 %s410_s10, 7 }
  0x38   : > { %277 = vtanh.f32 %v132_v0  ;;  %s149_s26 = sshll.u32 %s131_s25, 4  ;;  %s508_s30 = scalar_lea.hbm %s551_s1, %s228_s27  ;;  %s503_s26 = int_to_ptr.vmem [resolvable:$true] %s149_s26 }
  0x39   : > { %s136_s17 = scalar_lea.sflag [#allocation4], %s494_s21  ;;  %s309_s2 = scalar_lea.vmem %s503_s26, 128 }
  0x3a   : > { %p310_p6 = scmp.ne.s32.totalorder %s503_s26, %s309_s2  ;;  %p560_p11 = scmp.ne.s32.totalorder %s555_s18, 0 }
  0x3b   : > { %s378_s3 = smov [#allocation5]  }
  0x3c   : > { %p311_p12 = pnand %p310_p6, %p560_p11  ;;  %s313_s10 = sshll.u32 %s378_s3, 4  ;;  %s314_s10 = int_to_ptr.vmem [resolvable:$false] %s313_s10 }
  0x3d   : > { %s315_s4 = scalar_lea.vmem %s314_s10, 256  ;;  %p316_p7 = scmp.lt.s32.totalorder %s503_s26, %s314_s10 }
  0x3e   : > { %p312_p13 = pneg %p311_p12  ;;  %p317_p10 = scmp.lt.s32.totalorder %s315_s4, %s309_s2 }
  0x40   : > { %p318_p2 = por %p317_p10, %p316_p7 }
  0x42   : > { %v278_v1 = vpop.eup %277  ;;  %p319_p4 = pnand %p318_p2, %p312_p13 }
  0x43   : > { %134 = vst [vmem:[%s131_s25] sm:$0xff] %v278_v1 }
  0x44   : > { %322 = shalt.err (!%p319_p4)
}
  0x45   : > { %s323_s5 = scalar_lea.hbm %s508_s30, 128  ;;  %s327_s14 = scalar_lea.hbm %s551_s1, 256 }
  0x46   : > { %p324_p5 = scmp.ne.s32.totalorder %s508_s30, %s323_s5  ;;  %p328_p0 = scmp.lt.u32.totalorder %s508_s30, %s551_s1 }
  0x47   : > { %p329_p1 = scmp.lt.u32.totalorder %s327_s14, %s323_s5  ;;  %p331_p6 = scmp.lt.u32.totalorder %s323_s5, %s508_s30 }
  0x48   : > { %p325_p8 = pnand %p324_p5, %p560_p11 }
  0x49   : > { %p330_p3 = por %p329_p1, %p328_p0 }
  0x4a   : > { %p326_p9 = pneg %p325_p8 }
  0x4b   : > { %p332_p12 = por %p331_p6, %p330_p3 }
  0x4d   : > { %p333_p13 = pnand %p332_p12, %p326_p9 }
  0x4f   : > { %336 = shalt.err (!%p333_p13)
}
  0x50   : > { %233 = dma.vmem_to_hbm [thread:$0]  (%p560_p11), %s503_s26, 128, %s508_s30, %s136_s17  }
  0x51 PF: > { %s161_s21 = sand.u32 1, %s363_s6   ;;  %p561_p7 = scmp.ne.s32.totalorder %s556_s19, 0 }
  0x52   : > { %p562_p10 = scmp.ge.s32.totalorder %s375_s9, 2  ;;  %s162_s22 = scalar_lea.sflag [#allocation4], %s161_s21 }
  0x54   : > { %p240_p2 = pnand %p562_p10, %p561_p7 }
  0x56   : > { %358 = dma.done.wait (!%p240_p2), %s162_s22, 128  }
  0x57   : > { %360 = vsyncadd (!%p240_p2), %s162_s22, 4294967168  ;;  %p14_p4 = scmp.ge.s32.totalorder %s414_s12, 4   ;;  %s563_s6 = smov %s367_s7 }
  0x58   : > { %s564_s7 = smov %s371_s8  ;;  %s565_s8 = smov %s426_s15 }
  0x59   : > { %s566_s9 = smov %s414_s12  ;;  %16 = sbr.rel (!%p14_p4) target bundleno = 5 (0x5), region = 69 }
  0x60   :  { %167 = vsyncpa [#allocation3], 1 }
  0x61   :  { %169 = vsyncpa [#allocation3 + $0x1], 1 }
  0x62   :  { %170 = vsyncpa [#allocation4], 1 }
  0x63   :  { %172 = vsyncpa [#allocation4 + $0x1], 1 }

</bundles_post_ra>
